<compile_context>
chip_gen: v7x
topology: tpu7x:2x2x1
jax: 0.10.0
libtpu: 0.0.40
codegen_flags: <defaults>
</compile_context>

<pallas_src>
import functools

import jax
import jax.numpy as jnp
from jax.experimental import pallas as pl
from jax.experimental.pallas import tpu as pltpu


def _add_readout_kernel(x_ref, o_ref, *, start_index: int):
    # x_ref: (1, S, TD) VMEM tile for one batch element / one hidden tile.
    # o_ref: (1, S - start_index, TD)
    if start_index == 2:
        # Mean of the two readout tokens, computed in the input dtype to
        # match the PyTorch module bit-for-bit (0.5 is exact in bf16/f32).
        readout = (x_ref[0, 0, :] + x_ref[0, 1, :]) * 0.5
    else:
        # No f32 round-trip needed: readout is an identity copy of token 0.
        readout = x_ref[0, 0, :]
    # TODO(synk): verify via bundle dump that this sublane-shift slice lowers
    # to per-vreg rotates/selects rather than a full VMEM relayout copy; if it
    # copies, switch the body tokens to a second element-offset in_spec.
    o_ref[0] = x_ref[0, start_index:, :] + readout[None, :]


def _vmem_budget_bytes():
    """Per-step double-buffered (in+out) working-set budget, per generation."""
    try:
        kind = jax.devices()[0].device_kind.lower()
    except Exception:  # pragma: no cover - defensive, e.g. interpret mode
        kind = ""
    if ("v6" in kind) or ("v7" in kind) or ("7x" in kind):
        # Default scoped-VMEM limit is 32 MiB on v6e/v7x; leave headroom.
        return 22 * 1024 * 1024
    # v5e default scoped limit is 16 MiB; also the safe fallback for unknown.
    return 12 * 1024 * 1024


def _choose_hidden_tile(B, S, S_out, D, dtype, *, min_steps=8):
    """Pick a lane-dense hidden-dim tile width.

    Priorities:
      1. Fit the double-buffered in+out working set in the per-generation
         VMEM budget (hard).
      2. Reach at least `min_steps` total grid steps (B * n_d) so the DMA
         pipeline has depth and both v7x TensorCores get work -- but never at
         the cost of strided HBM runs shorter than ~1 KiB.
      3. Prefer the largest (ideally full-D, fully contiguous) tile once the
         step requirement is already met, to amortize per-step overhead.
    """
    if D % 128 != 0:
        # Full-width last dim (block dim == full array dim is always legal).
        # TODO(synk): could cdiv-tile with one masked edge d-tile instead;
        # only matters if production D is not a multiple of 128.
        return D

    dtype_bytes = jnp.dtype(dtype).itemsize
    budget = _vmem_budget_bytes()

    def working_set(td):
        # Double-buffered input tile + output tile.
        return 2 * (S + S_out) * td * dtype_bytes

    def round_up_128(n):
        return ((n + 127) // 128) * 128

    # Contiguity floors: each (1, S, td) block is S strided HBM runs of
    # td*dtype_bytes on both the read and the write side.
    soft_floor = min(D, round_up_128((2048 + dtype_bytes - 1) // dtype_bytes))
    relaxed_floor = min(D, round_up_128((1024 + dtype_bytes - 1) // dtype_bytes))

    cands = [td for td in range(128, D + 1, 128) if working_set(td) <= budget]
    if not cands:
        return 128  # pathological S; smallest lane-dense tile.

    needed_nd = max(1, -(-min_steps // max(B, 1)))

    def pick(floor):
        ok = [td for td in cands
              if td >= floor and pl.cdiv(D, td) >= needed_nd]
        return max(ok) if ok else None

    td = pick(soft_floor)
    if td is None:
        td = pick(relaxed_floor)
    if td is not None:
        return td
    # Pipeline depth is unreachable without sub-1KiB runs: maximize the step
    # count subject to the relaxed contiguity floor instead.
    ok = [td for td in cands if td >= relaxed_floor]
    return min(ok) if ok else max(cands)


def add_readout(x, start_index=1, *, td=None):
    """Pallas implementation of AddReadout.forward.

    Args:
      x: (B, S, D) array.
      start_index: 1 or 2, matching the PyTorch module.
      td: optional override for the hidden-dim tile width (multiple of 128,
          or equal to D).

    Returns:
      (B, S - start_index, D) array, same dtype as x.
    """
    B, S, D = x.shape
    S_out = S - start_index

    if td is None:
        td = _choose_hidden_tile(B, S, S_out, D, x.dtype)
    assert td == D or (td % 128 == 0 and td <= D), (
        "hidden-dim tile must be a multiple of 128 (or the full hidden dim)")
    n_d = pl.cdiv(D, td)

    kernel = functools.partial(_add_readout_kernel, start_index=start_index)

    dtype_bytes = jnp.dtype(x.dtype).itemsize
    cost = pl.CostEstimate(
        flops=B * S_out * D + (2 * B * D if start_index == 2 else 0),
        transcendentals=0,
        bytes_accessed=(B * S * D + B * S_out * D) * dtype_bytes,
    )

    return pl.pallas_call(
        kernel,
        out_shape=jax.ShapeDtypeStruct((B, S_out, D), x.dtype),
        grid_spec=pltpu.PrefetchScalarGridSpec(
            num_scalar_prefetch=0,
            grid=(B, n_d),
            in_specs=[
                # Token dim equals the full array dim (no (8,128) issue);
                # hidden dim is a lane-dense multiple-of-128 tile (only the
                # final d-tile, if any, is a masked edge block).
                pl.BlockSpec((1, S, td), lambda b, d: (b, 0, d)),
            ],
            out_specs=pl.BlockSpec((1, S_out, td), lambda b, d: (b, 0, d)),
        ),
        compiler_params=pltpu.CompilerParams(
            dimension_semantics=("parallel", "parallel"),
        ),
        cost_estimate=cost,
    )(x)


def add_readout_ref(x, start_index=1):
    """Pure-JAX reference matching the PyTorch forward."""
    if start_index == 2:
        readout = (x[:, 0] + x[:, 1]) / 2
    else:
        readout = x[:, 0]
    return x[:, start_index:] + readout[:, None, :]


if __name__ == "__main__":
    key = jax.random.PRNGKey(0)

    # Small ViT-like shapes: batch=2, tokens=17 (1 cls + 16 patches), hidden=256.
    B, S, D = 2, 17, 256
    x = jax.random.normal(key, (B, S, D), dtype=jnp.float32)

    # start_index = 1 (module default), auto hidden-dim tile.
    out1 = jax.block_until_ready(add_readout(x, start_index=1))
    ref1 = add_readout_ref(x, start_index=1)
    assert out1.shape == (B, S - 1, D)
    assert jnp.allclose(out1, ref1, atol=1e-6), "start_index=1 mismatch"

    # start_index = 2 branch.
    out2 = jax.block_until_ready(add_readout(x, start_index=2))
    ref2 = add_readout_ref(x, start_index=2)
    assert out2.shape == (B, S - 2, D)
    assert jnp.allclose(out2, ref2, atol=1e-6), "start_index=2 mismatch"

    # Explicit multi-tile hidden dim (grid = (B, 2)) to exercise D tiling.
    out3 = jax.block_until_ready(add_readout(x, start_index=1, td=128))
    assert jnp.allclose(out3, ref1, atol=1e-6), "td=128 mismatch"

    # Non-divisible lane tiling: grid uses cdiv, final d-tile is a masked
    # edge block (exercises the OOB-read / dropped-write path).
    x_e = jax.random.normal(jax.random.PRNGKey(1), (2, 9, 384), jnp.float32)
    out4 = jax.block_until_ready(add_readout(x_e, start_index=1, td=256))
    assert jnp.allclose(out4, add_readout_ref(x_e, 1), atol=1e-6), \
        "edge-tile mismatch"

    # bf16 path (packed sublanes, dtype-exact readout mean).
    x_bf = x.astype(jnp.bfloat16)
    out5 = jax.block_until_ready(add_readout(x_bf, start_index=2))
    ref5 = add_readout_ref(x_bf, start_index=2)
    assert jnp.allclose(out5.astype(jnp.float32), ref5.astype(jnp.float32),
                        atol=1e-2), "bf16 mismatch"

    # Non-multiple-of-128 hidden dim falls back to a full-width last dim block.
    x_s = jax.random.normal(jax.random.PRNGKey(2), (2, 9, 32), jnp.float32)
    out6 = jax.block_until_ready(add_readout(x_s, start_index=1))
    assert jnp.allclose(out6, add_readout_ref(x_s, 1), atol=1e-6), \
        "small-D fallback mismatch"

    print("KERNEL_OK")
</pallas_src>

<mosaic_0001>
module attributes {stable_mosaic.version = 11 : i64} {
  func.func @_add_readout_kernel(%arg0: i32, %arg1: i32, %arg2: memref<1x17x256xf32, #tpu.memory_space<vmem>>, %arg3: memref<1x16x256xf32, #tpu.memory_space<vmem>>) attributes {dimension_semantics = [#tpu.dimension_semantics<parallel>, #tpu.dimension_semantics<parallel>], iteration_bounds = array<i64: 2, 1>, scalar_prefetch = 0 : i64, scratch_operands = 0 : i64, tpu.core_type = #tpu.core_type<tc>, window_params = [{transform_indices = @transform_0, window_bounds = array<i64: 1, 17, 256>}, {transform_indices = @transform_1, window_bounds = array<i64: 1, 16, 256>}]} {
    %c0 = arith.constant 0 : index
    %c0_0 = arith.constant 0 : index
    %c0_1 = arith.constant 0 : index
    %0 = vector.load %arg2[%c0, %c0_0, %c0_1] : memref<1x17x256xf32, #tpu.memory_space<vmem>>, vector<1x1x256xf32>
    %1 = vector.shape_cast %0 : vector<1x1x256xf32> to vector<256xf32>
    %c0_2 = arith.constant 0 : index
    %c1 = arith.constant 1 : index
    %c0_3 = arith.constant 0 : index
    %2 = vector.load %arg2[%c0_2, %c1, %c0_3] : memref<1x17x256xf32, #tpu.memory_space<vmem>>, vector<1x16x256xf32>
    %3 = vector.shape_cast %2 : vector<1x16x256xf32> to vector<16x256xf32>
    %4 = vector.shape_cast %1 : vector<256xf32> to vector<1x256xf32>
    %5 = vector.broadcast %4 : vector<1x256xf32> to vector<16x256xf32>
    %6 = arith.addf %3, %5 : vector<16x256xf32>
    %c0_4 = arith.constant 0 : index
    %c0_5 = arith.constant 0 : index
    %c0_6 = arith.constant 0 : index
    %7 = vector.load %arg3[%c0_4, %c0_5, %c0_6] : memref<1x16x256xf32, #tpu.memory_space<vmem>>, vector<1x16x256xf32>
    %8 = vector.shape_cast %7 : vector<1x16x256xf32> to vector<16x256xf32>
    %9 = vector.shape_cast %6 : vector<16x256xf32> to vector<1x16x256xf32>
    tpu.vector_store %arg3[%c0_4, %c0_5, %c0_6], %9 {strides = array<i32>} : memref<1x16x256xf32, #tpu.memory_space<vmem>>, vector<1x16x256xf32>,
    return
  }
  func.func @transform_0(%arg0: i32, %arg1: i32) -> (i32, i32, i32) {
    %c0_i32 = arith.constant 0 : i32
    %c0_i32_0 = arith.constant 0 : i32
    return %arg0, %c0_i32, %arg1 : i32, i32, i32
  }
  func.func @transform_1(%arg0: i32, %arg1: i32) -> (i32, i32, i32) {
    %c0_i32 = arith.constant 0 : i32
    %c0_i32_0 = arith.constant 0 : i32
    return %arg0, %c0_i32, %arg1 : i32, i32, i32
  }
}

</mosaic_0001>

<bundles_post_ra>
// kernel: tpu_custom_call.1
= control target key start
LH: loop header
LB: loop body
LE: loop exit
PB: predicated region body
PF: predicated region fallthrough
CT: control target
= control target key end

     0   :  { %6 = vsyncpa [#allocation3], 0  ;;  %s577_s0 = inlined_call_operand.vmem [shape: f32[2,17,256], index: 0, kind: input, shape index: {}]   ;;  %s578_s1 = inlined_call_operand.hbm [shape: f32[2,16,256], index: 1, kind: output, shape index: {}]  }
   0x1   :  { %8 = vsyncpa [#allocation3 + $0x1], 0  ;;  %s454_s6 = smov 0   ;;  %s456_s7 = smov 0  }
   0x2   :  { %s458_s8 = smov 0   ;;  %s460_s9 = smov 0  }
   0x3   :  { %s462_s10 = smov 0   ;;  %s464_s11 = smov 0  }
   0x4 LB: > { %s290_s12 = sadd.s32 4294967295, %s439_s11   ;;  %s291_s13 = sadd.s32 4294967294, %s439_s11   ;;  %s439_s11 = sphi %s464_s11, %s14_s11   ;;  %s435_s10 = sphi %s462_s10, %s585_s10   ;;  %s431_s9 = sphi %s460_s9, %s584_s9   ;;  %s427_s8 = sphi %s458_s8, %s583_s8   ;;  %s423_s7 = sphi %s456_s7, %s582_s7   ;;  %s419_s6 = sphi %s454_s6, %s581_s6  }
   0x5   : > { %s26_s14 = sadd.s32 1, %s435_s10  ;;  %s63_s15 = sadd.s32 1, %s427_s8 }
   0x6   : > { %p28_p0 = scmp.ge.s32.totalorder %s26_s14, 2  ;;  %p73_p1 = scmp.ne.s32.totalorder %s427_s8, %s423_s7 }
   0x7   : > { %p74_p2 = scmp.eq.s32.totalorder %s290_s12, 1  ;;  %p79_p3 = scmp.ne.s32.totalorder %s423_s7, %s419_s6 }
   0x8   : > { %s587_s14 = smov (%p28_p0, %s26_s14), 0  ;;  %p80_p5 = scmp.eq.s32.totalorder %s291_s13, 1 }
   0x9   : > { %p494_p4 = por %p74_p2, %p73_p1  ;;  %s58_s17 = ssub.s32 %s435_s10, %s587_s14 }
   0xa   : > { %p294_p6 = scmp.ge.s32.totalorder %s439_s11, 1  ;;  %p61_p7 = scmp.eq.s32.totalorder %s58_s17, 0 }
   0xb   : > { %p501_p8 = por %p80_p5, %p79_p3  ;;  %p111_p9 = scmp.lt.s32.totalorder %s439_s11, 3 }
   0xc   : > { %s507_s19 = scalar_select %p61_p7, %s427_s8, %s63_s15  }
   0xd   : > { %p112_p10 = pnand %p294_p6, %p111_p9 }
   0xe   : > { %p136_p11 = scmp.lt.s32.totalorder (!%p112_p10), %s431_s9, 1  ;;  %v154_v0 = vlaneseq (!%p112_p10)  ;;  %s132_s20 = sand.u32 (!%p112_p10), 1, %s423_s7   ;;  %vm176_vm0 = vcmask (!%p112_p10), 1046528  }
   0xf   : > { %115 = sbr.rel (%p112_p10) target bundleno = 51 (0x33), region = 24  ;;  %s295_s22 = sshll.u32 (!%p112_p10), %s132_s20, 5 }
  0x10   : > { %v155_v1 = vshrl.u32 (!%p112_p10), %v154_v0, 7  ;;  %s134_s27 = scalar_lea.vmem (!%p112_p10), [#allocation2], %s295_s22  ;;  %s302_s29 = sshll.u32 (!%p112_p10), %s431_s9, 9 }
  0x11   : > { %s211_s28 = sshll.u32 (!%p112_p10), %s134_s27, 4  ;;  %s523_s3 = scalar_lea.hbm (!%p112_p10), %s578_s1, %s302_s29  ;;  %s518_s28 = int_to_ptr.vmem [resolvable:$true] %s211_s28 }
  0x12   : > { %v156_v2 = vsub.s32 (!%p112_p10), 0, %v155_v1  ;;  %v160_v3 = vsub.s32 (!%p112_p10), 1, %v155_v1  ;;  %s531_s4 = scalar_lea.sflag (!%p112_p10), [#allocation3], %s132_s20  ;;  %s361_s5 = scalar_lea.vmem (!%p112_p10), %s518_s28, 512 }
  0x13   : > { %p362_p12 = scmp.ne.s32.totalorder (!%p112_p10), %s518_s28, %s361_s5 }
  0x15   : > { %p363_p13 = pnand (!%p112_p10), %p362_p12, %p494_p4 }
  0x16   : > { %s137_s21 = scalar_select %p136_p11, %s431_s9, 1 }
  0x17   : > { %p364_p0 = pneg %p363_p13  ;;  %s441_s9 = smov [#allocation2]  }
  0x18   : > { %s303_s23 = smul.u32 48, %s137_s21  ;;  %s365_s12 = sshll.u32 %s441_s9, 4  ;;  %s366_s12 = int_to_ptr.vmem [resolvable:$false] %s365_s12 }
  0x19   : > { %s367_s13 = scalar_lea.vmem %s366_s12, 1024  ;;  %p368_p1 = scmp.lt.s32.totalorder %s518_s28, %s366_s12 }
  0x1a   : > { %s143_s26 = scalar_lea.vmem %s577_s0, %s303_s23  ;;  %p369_p2 = scmp.lt.s32.totalorder %s367_s13, %s361_s5 }
  0x1b   : > { %v146_v4 = vld [vmem:[%s143_s26] ss:$8 sm:$0x3]  ;;  %v147_v5 = vld [vmem:[%s143_s26] sm:$0xfe]  ;;  %v149_v6 = vld [vmem:[%s143_s26 + $0x10] sm:$0xff] }
  0x1c   : > { %v157_v7 = vrot.slane %v146_v4, %v156_v2  ;;  %v148_v8 = vld [vmem:[%s143_s26 + $0x8] sm:$0xfe]  ;;  %v150_v9 = vld [vmem:[%s143_s26 + $0x18] sm:$0xff]  ;;  %v161_v10 = vrot.slane %v146_v4, %v160_v3  ;;  %v151_v11 = vld [vmem:[%s143_s26 + $0x20] sm:$0x1]  ;;  %p370_p3 = por %p369_p2, %p368_p1 }
  0x1d   : > { %v152_v12 = vld [vmem:[%s143_s26 + $0x28] sm:$0x1] }
  0x1e   : > { %v164_v13 = vadd.f32 %v157_v7, %v147_v5  ;;  %v166_v14 = vadd.f32 %v157_v7, %v149_v6  ;;  %v165_v15 = vadd.f32 %v161_v10, %v148_v8  ;;  %v167_v16 = vadd.f32 %v161_v10, %v150_v9  ;;  %p371_p5 = pnand %p370_p3, %p364_p0 }
  0x1f   : > { %v168_v17 = vadd.f32 %v157_v7, %v151_v11  ;;  %v169_v18 = vadd.f32 %v161_v10, %v152_v12 }
  0x20   : > { %v177_v19 = vrot.slane %v164_v13, 1  ;;  %v178_v20 = vrot.slane %v166_v14, 1  ;;  %v180_v21 = vrot.slane %v165_v15, 1  ;;  %v181_v22 = vrot.slane %v167_v16, 1 }
  0x21   : > { %v183_v23 = vrot.slane %v168_v17, 1  ;;  %v185_v24 = vrot.slane %v169_v18, 1 }
  0x22   : > { %v179_v25 = vsel %vm176_vm0, %v177_v19, %v178_v20  ;;  %v182_v26 = vsel %vm176_vm0, %v180_v21, %v181_v22 }
  0x23   : > { %191 = vst [vmem:[%s134_s27] sm:$0xff] %v179_v25  ;;  %192 = vst [vmem:[%s134_s27 + $0x8] sm:$0xff] %v182_v26  ;;  %v184_v27 = vsel %vm176_vm0, %v178_v20, %v183_v23  ;;  %v186_v28 = vsel %vm176_vm0, %v181_v22, %v185_v24 }
  0x24   : > { %193 = vst [vmem:[%s134_s27 + $0x10] sm:$0xff] %v184_v27  ;;  %194 = vst [vmem:[%s134_s27 + $0x18] sm:$0xff] %v186_v28 }
  0x25   : > { %374 = shalt.err (!%p371_p5)
}
  0x26   : > { %s375_s15 = scalar_lea.hbm %s523_s3, 512  ;;  %s379_s21 = scalar_lea.hbm %s578_s1, 1024 }
  0x27   : > { %p376_p6 = scmp.ne.s32.totalorder %s523_s3, %s375_s15  ;;  %p380_p10 = scmp.lt.u32.totalorder %s523_s3, %s578_s1 }
  0x28   : > { %p381_p11 = scmp.lt.u32.totalorder %s379_s21, %s375_s15  ;;  %p383_p13 = scmp.lt.u32.totalorder %s375_s15, %s523_s3 }
  0x29   : > { %p377_p7 = pnand %p376_p6, %p494_p4 }
  0x2a   : > { %p382_p12 = por %p381_p11, %p380_p10 }
  0x2b   : > { %p378_p9 = pneg %p377_p7 }
  0x2c   : > { %p384_p0 = por %p383_p13, %p382_p12 }
  0x2e   : > { %p385_p1 = pnand %p384_p0, %p378_p9 }
  0x30   : > { %388 = shalt.err (!%p385_p1)
}
  0x31   : > { %s442_s24 = smov 256   ;;  %s443_s25 = smov 16  }
  0x32   : > { %304 = dma.vmem_to_hbm [thread:$0]  (%p494_p4), %s518_s28, 512, %s523_s3, %s531_s4, %s442_s24, %s442_s24, %s443_s25  }
  0x33 PF: > { %p310_p2 = scmp.ge.s32.totalorder %s439_s11, 2  ;;  %s226_s26 = sand.u32 1, %s419_s6  }
  0x34   : > { %s227_s27 = scalar_lea.sflag [#allocation3], %s226_s26 }
  0x35   : > { %p307_p3 = pnand %p310_p2, %p501_p8 }
  0x37   : > { %414 = dma.done.wait (!%p307_p3), %s227_s27, 512  }
  0x38   : > { %416 = vsyncadd (!%p307_p3), %s227_s27, 4294966784  ;;  %s14_s11 = sadd.s32 1, %s439_s11   ;;  %s581_s6 = smov %s423_s7 }
  0x39   : > { %p11_p5 = scmp.ge.s32.totalorder %s14_s11, 4   ;;  %s582_s7 = smov %s427_s8 }
  0x3a   : > { %s583_s8 = smov %s507_s19  ;;  %s584_s9 = smov %s435_s10 }
  0x3b   : > { %s585_s10 = smov %s587_s14  ;;  %13 = sbr.rel (!%p11_p5) target bundleno = 4 (0x4), region = 59 }
  0x42   :  { %232 = vsyncpa [#allocation3], 1 }
  0x43   :  { %234 = vsyncpa [#allocation3 + $0x1], 1 }

</bundles_post_ra>
